<compile_context>
chip_gen: v7x
topology: tpu7x:2x2x1
jax: 0.10.0
libtpu: 0.0.40
codegen_flags: <defaults>
</compile_context>

<pallas_src>
import numpy as np
import jax
import jax.numpy as jnp
from jax.experimental import pallas as pl
from jax.experimental.pallas import tpu as pltpu

N_POWER = 1         # fixed to 1 in the reference module
XI = 0.001          # present in the module but unused by its forward
EPSILON = 0.5
PAIR_EPS = 1e-6     # F.pairwise_distance default eps (added to the difference)
NORM_EPS = 1e-8     # l2_normalize eps
LANE = 128


def _make_vat_kernel(TB, K, KP, B_total):
    # Lane-padded class columns carry a constant +PAIR_EPS in v1/v2; subtract
    # their fixed contribution instead of masking with where-selects.
    pad_corr = float((KP - K) * PAIR_EPS * PAIR_EPS)

    def kernel(r_ref, w_ref, g_ref, res_ref, loss_ref):
        tile = pl.program_id(0)

        res = res_ref[...]                                        # [TB, KP] f32

        # The only D-sized matmul left: perturbation through the linear model
        # (bf16 operands, f32 accumulation on the MXU).
        rW = jnp.dot(r_ref[...], w_ref[...],
                     preferred_element_type=jnp.float32)          # [TB, KP]

        # ---- power iteration (n_power = 1) ------------------------------
        # v1 = logit - model(x + r) + eps = res - r@W + eps
        # TODO(synk): for n_power > 1 wrap this block in a lax.fori_loop
        #             (subsequent iterations only need g_o1 @ G, no D matmul).
        v1 = res - rW + PAIR_EPS
        sq1 = jnp.sum(v1 * v1, axis=-1, keepdims=True) - pad_corr
        inv_n1 = jax.lax.rsqrt(jnp.maximum(sq1, 1e-24))           # EUP; floor avoids NaN
        g_o1 = v1 * (-inv_n1)                                     # d dist / d o1

        # grad_r = g_o1 @ W^T.  Downstream we only need grad_r@W and
        # ||grad_r||, both expressible via the Gram matrix G = W^T @ W:
        h = jnp.dot(g_o1, g_ref[...],
                    preferred_element_type=jnp.float32)           # grad_r @ W
        gsq = jnp.sum(g_o1 * h, axis=-1, keepdims=True)           # ||grad_r||^2
        scale = EPSILON / (jnp.sqrt(jnp.maximum(gsq, 0.0)) + NORM_EPS)

        # v2 = logit - model(x + r_adv) + eps = res - scale * (grad_r@W) + eps
        v2 = res - scale * h + PAIR_EPS
        sq2 = jnp.sum(v2 * v2, axis=-1, keepdims=True) - pad_corr
        d2 = jnp.sqrt(jnp.maximum(sq2, 0.0))                      # [TB, 1]

        # Zero rows past the real batch (last-tile padding), then reduce.
        row = tile * TB + jax.lax.broadcasted_iota(jnp.int32, (TB, 1), 0)
        d2 = jnp.where(row < B_total, d2, 0.0)
        tile_loss = jnp.sum(d2, axis=0, keepdims=True)            # [1, 1]
        loss_ref[...] = jnp.broadcast_to(tile_loss.reshape(1, 1, 1), (1, 8, LANE))

    return kernel


def _vmem_budget_bytes():
    """Per-generation VMEM budget (v5e/v6e: 128 MiB physical; v7x: 64 MiB)."""
    try:
        kind = jax.devices()[0].device_kind.lower()
    except Exception:
        kind = ""
    if "v5" in kind or "v6" in kind:
        return 100 * 1024 * 1024
    return 48 * 1024 * 1024            # v7x / unknown: stay under 64 MiB


def _pick_tb(B, D, KP, resident_bytes, budget):
    """Batch tile: biggest that fits after resident weights are accounted for."""
    # per-row live bytes: r (bf16, 2 pipeline buffers) + res (f32, 2 buffers)
    # + a handful of f32 KP-wide temporaries (rW, v1, g_o1, h, v2).
    per_row = 4 * D + 32 * KP + 64
    avail = max(budget - resident_bytes, 4 << 20)
    tb = avail // per_row
    if B >= 256:
        tb = min(tb, (B + 1) // 2)     # >= 2 tiles: lets "parallel" shard 2 TCs (v7x)
    if tb >= B:
        return int(B)                  # block == full dim is always legal
    if tb >= 128:
        return int((tb // 128) * 128)  # fill MXU LHS rows
    return int(max(8, (tb // 8) * 8))  # sublane multiple


def _resident_spec(shape):
    """Grid-invariant input: constant index map, single-buffered if supported."""
    index_map = lambda i: (0,) * len(shape)
    try:
        return pl.BlockSpec(shape, index_map, pipeline_mode=pl.Buffered(1))
    except Exception:
        return pl.BlockSpec(shape, index_map)


def vat_forward(X, logit, W, b, key):
    """VAT.forward(X, logit) for model(x) = flatten(x) @ W + b."""
    B = X.shape[0]
    D = int(np.prod(X.shape[1:]))
    K = W.shape[1]
    KP = ((K + LANE - 1) // LANE) * LANE
    # torch.normal(0, epsilon / sqrt(x.dim()), x.shape): x.dim() of the NCHW tensor.
    sigma = float(EPSILON / np.sqrt(X.ndim))

    x_flat = X.reshape(B, D).astype(jnp.float32)
    Wf = jnp.asarray(W, jnp.float32)
    bf = jnp.asarray(b, jnp.float32).reshape(1, K)

    # Precomputed outside the kernel (Gram restructure): residual and W^T @ W.
    # res is kept explicit in f32 (callers may pass logits != x@W + b).
    res = jnp.asarray(logit, jnp.float32) - (x_flat @ Wf + bf)      # [B, K]
    gram = Wf.T @ Wf                                                # [K, K]

    # r ~ N(0, sigma): host PRNG (in-kernel TPU PRNG does not lower on CPU
    # interpret); bf16 is fine since the perturbation is l2-normalized anyway.
    r = (sigma * jax.random.normal(key, (B, D), dtype=jnp.float32)
         ).astype(jnp.bfloat16)

    # Lane-pad the class axis to 128 with zero columns; bf16 weights for MXU.
    Wp = jnp.zeros((D, KP), jnp.bfloat16).at[:, :K].set(Wf.astype(jnp.bfloat16))
    Gp = jnp.zeros((KP, KP), jnp.float32).at[:K, :K].set(gram)
    resp = jnp.zeros((B, KP), jnp.float32).at[:, :K].set(res)

    resident = 2 * (D * KP * 2) + 2 * (KP * KP * 4)   # conservative (2 buffers)
    budget = _vmem_budget_bytes()
    TB = _pick_tb(B, D, KP, resident, budget)
    nt = -(-B // TB)
    Bp = nt * TB
    if Bp != B:
        r = jnp.pad(r, ((0, Bp - B), (0, 0)))
        resp = jnp.pad(resp, ((0, Bp - B), (0, 0)))

    in_specs = [
        pl.BlockSpec((TB, D), lambda i: (i, 0)),       # r tile     (bf16, pipelined)
        _resident_spec((D, KP)),                       # W          (bf16, resident)
        _resident_spec((KP, KP)),                      # G = W^T W  (f32,  resident)
        pl.BlockSpec((TB, KP), lambda i: (i, 0)),      # res tile   (f32,  pipelined)
    ]
    out_specs = pl.BlockSpec((1, 8, LANE), lambda i: (i, 0, 0))

    required = resident + 4 * TB * D + 8 * TB * KP + (6 << 20)
    vmem_limit = int(min(max(required, 32 << 20), 112 << 20))
    compiler_params = pltpu.CompilerParams(
        dimension_semantics=("parallel",),             # megacore-shard batch tiles
        vmem_limit_bytes=vmem_limit,
    )
    cost = pl.CostEstimate(
        flops=int(2 * Bp * D * KP + 2 * Bp * KP * KP),
        transcendentals=int(3 * Bp),
        bytes_accessed=int(2 * Bp * D + 2 * D * KP + 4 * KP * KP
                           + 4 * Bp * KP + 4 * nt * 8 * LANE),
    )

    partial = pl.pallas_call(
        _make_vat_kernel(TB, K, KP, B),
        out_shape=jax.ShapeDtypeStruct((nt, 8, LANE), jnp.float32),
        grid=(nt,),
        in_specs=in_specs,
        out_specs=out_specs,
        compiler_params=compiler_params,
        cost_estimate=cost,
    )(r, Wp, Gp, resp)

    return jnp.sum(partial[:, 0, 0])


if __name__ == "__main__":
    key = jax.random.PRNGKey(0)
    kx, kw, kr = jax.random.split(key, 3)

    B, C, H, Wsp = 2, 4, 16, 16
    K = 16                      # number of classes of the wrapped classifier
    D = C * H * Wsp

    X = jax.random.normal(kx, (B, C, H, Wsp), dtype=jnp.float32)
    Wmat = 0.02 * jax.random.normal(kw, (D, K), dtype=jnp.float32)
    bvec = jnp.zeros((1, K), dtype=jnp.float32)

    # Caller-supplied clean logits: logit = model(X)
    logit = X.reshape(B, D) @ Wmat + bvec

    loss = vat_forward(X, logit, Wmat, bvec, kr)
    loss = jax.block_until_ready(loss)
    assert np.isfinite(float(loss)), "VAT loss is not finite"

    # Pure-JAX reference of the un-restructured VAT math (explicit W^T matmul
    # and explicit second forward pass), using the same bf16-quantized noise
    # the kernel consumed.  Validates the Gram-matrix restructure.
    sigma = EPSILON / float(np.sqrt(X.ndim))
    r0 = (sigma * jax.random.normal(kr, (B, D), dtype=jnp.float32)
          ).astype(jnp.bfloat16).astype(jnp.float32)
    x = X.reshape(B, D)
    model = lambda z: z @ Wmat + bvec
    v1 = logit - model(x + r0) + PAIR_EPS
    n1 = jnp.sqrt(jnp.maximum(jnp.sum(v1 * v1, axis=-1, keepdims=True), 1e-24))
    grad = (-(v1 / n1)) @ Wmat.T
    r_adv = EPSILON * grad / (
        jnp.sqrt(jnp.sum(grad * grad, axis=-1, keepdims=True)) + NORM_EPS)
    v2 = logit - model(x + r_adv) + PAIR_EPS
    loss_ref = jnp.sum(jnp.sqrt(jnp.sum(v2 * v2, axis=-1)))
    np.testing.assert_allclose(float(loss), float(loss_ref), rtol=0.08, atol=1e-4)

    print("KERNEL_OK")
</pallas_src>

<mosaic_0001>
module attributes {stable_mosaic.version = 11 : i64} {
  func.func @kernel(%arg0: i32, %arg1: memref<2x1024xbf16, #tpu.memory_space<vmem>>, %arg2: memref<1024x128xbf16, #tpu.memory_space<vmem>>, %arg3: memref<128x128xf32, #tpu.memory_space<vmem>>, %arg4: memref<2x128xf32, #tpu.memory_space<vmem>>, %arg5: memref<1x8x128xf32, #tpu.memory_space<vmem>>) attributes {dimension_semantics = [#tpu.dimension_semantics<parallel>], iteration_bounds = array<i64: 1>, scalar_prefetch = 0 : i64, scratch_operands = 0 : i64, tpu.core_type = #tpu.core_type<tc>, window_params = [{transform_indices = @transform_0, window_bounds = array<i64: 2, 1024>}, {pipeline_mode = #tpu.pipeline_mode<synchronous>, transform_indices = @transform_1, window_bounds = array<i64: 1024, 128>}, {pipeline_mode = #tpu.pipeline_mode<synchronous>, transform_indices = @transform_2, window_bounds = array<i64: 128, 128>}, {transform_indices = @transform_3, window_bounds = array<i64: 2, 128>}, {transform_indices = @transform_4, window_bounds = array<i64: 1, 8, 128>}]} {
    %c0 = arith.constant 0 : index
    %c0_0 = arith.constant 0 : index
    %0 = vector.load %arg4[%c0, %c0_0] : memref<2x128xf32, #tpu.memory_space<vmem>>, vector<2x128xf32>
    %c0_1 = arith.constant 0 : index
    %c0_2 = arith.constant 0 : index
    %1 = vector.load %arg1[%c0_1, %c0_2] : memref<2x1024xbf16, #tpu.memory_space<vmem>>, vector<2x1024xbf16>
    %c0_3 = arith.constant 0 : index
    %c0_4 = arith.constant 0 : index
    %2 = vector.load %arg2[%c0_3, %c0_4] : memref<1024x128xbf16, #tpu.memory_space<vmem>>, vector<1024x128xbf16>
    %cst = arith.constant dense<0.000000e+00> : vector<2x128xf32>
    %3 = tpu.matmul %1, %2, %cst {dimension_numbers = #tpu.dot_dimension_numbers<[1], [0], [0], [1], [0, 0, 1, 1], [], []>} : vector<2x1024xbf16>, vector<1024x128xbf16>, vector<2x128xf32> -> vector<2x128xf32>
    %4 = arith.subf %0, %3 : vector<2x128xf32>
    %cst_5 = arith.constant 9.99999997E-7 : f32
    %5 = vector.broadcast %cst_5 : f32 to vector<2x128xf32>
    %6 = arith.addf %4, %5 : vector<2x128xf32>
    %7 = arith.mulf %6, %6 : vector<2x128xf32>
    %cst_6 = arith.constant dense<0.000000e+00> : vector<2xf32>
    %8 = vector.multi_reduction <add>, %7, %cst_6 [1] : vector<2x128xf32> to vector<2xf32>
    %9 = vector.shape_cast %8 : vector<2xf32> to vector<2x1xf32>
    %cst_7 = arith.constant 1.120000e-10 : f32
    %10 = vector.broadcast %cst_7 : f32 to vector<2x1xf32>
    %11 = arith.subf %9, %10 : vector<2x1xf32>
    %cst_8 = arith.constant 1.000000e-24 : f32
    %12 = vector.broadcast %cst_8 : f32 to vector<2x1xf32>
    %13 = arith.maximumf %11, %12 : vector<2x1xf32>
    %14 = math.rsqrt %13 : vector<2x1xf32>
    %cst_9 = arith.constant 0.000000e+00 : f32
    %15 = vector.broadcast %cst_9 : f32 to vector<2x1xf32>
    %16 = arith.subf %15, %14 : vector<2x1xf32>
    %17 = vector.broadcast %16 : vector<2x1xf32> to vector<2x128xf32>
    %18 = arith.mulf %6, %17 : vector<2x128xf32>
    %c0_10 = arith.constant 0 : index
    %c0_11 = arith.constant 0 : index
    %19 = vector.load %arg3[%c0_10, %c0_11] : memref<128x128xf32, #tpu.memory_space<vmem>>, vector<128x128xf32>
    %cst_12 = arith.constant dense<0.000000e+00> : vector<2x128xf32>
    %20 = tpu.matmul %18, %19, %cst_12 {dimension_numbers = #tpu.dot_dimension_numbers<[1], [0], [0], [1], [0, 0, 1, 1], [], []>} : vector<2x128xf32>, vector<128x128xf32>, vector<2x128xf32> -> vector<2x128xf32>
    %21 = arith.mulf %18, %20 : vector<2x128xf32>
    %cst_13 = arith.constant dense<0.000000e+00> : vector<2xf32>
    %22 = vector.multi_reduction <add>, %21, %cst_13 [1] : vector<2x128xf32> to vector<2xf32>
    %23 = vector.shape_cast %22 : vector<2xf32> to vector<2x1xf32>
    %cst_14 = arith.constant 0.000000e+00 : f32
    %24 = vector.broadcast %cst_14 : f32 to vector<2x1xf32>
    %25 = arith.maximumf %23, %24 : vector<2x1xf32>
    %26 = math.sqrt %25 : vector<2x1xf32>
    %cst_15 = arith.constant 9.99999993E-9 : f32
    %27 = vector.broadcast %cst_15 : f32 to vector<2x1xf32>
    %28 = arith.addf %26, %27 : vector<2x1xf32>
    %cst_16 = arith.constant 5.000000e-01 : f32
    %29 = vector.broadcast %cst_16 : f32 to vector<2x1xf32>
    %30 = arith.divf %29, %28 : vector<2x1xf32>
    %31 = vector.broadcast %30 : vector<2x1xf32> to vector<2x128xf32>
    %32 = arith.mulf %31, %20 : vector<2x128xf32>
    %33 = arith.subf %0, %32 : vector<2x128xf32>
    %cst_17 = arith.constant 9.99999997E-7 : f32
    %34 = vector.broadcast %cst_17 : f32 to vector<2x128xf32>
    %35 = arith.addf %33, %34 : vector<2x128xf32>
    %36 = arith.mulf %35, %35 : vector<2x128xf32>
    %cst_18 = arith.constant dense<0.000000e+00> : vector<2xf32>
    %37 = vector.multi_reduction <add>, %36, %cst_18 [1] : vector<2x128xf32> to vector<2xf32>
    %38 = vector.shape_cast %37 : vector<2xf32> to vector<2x1xf32>
    %cst_19 = arith.constant 1.120000e-10 : f32
    %39 = vector.broadcast %cst_19 : f32 to vector<2x1xf32>
    %40 = arith.subf %38, %39 : vector<2x1xf32>
    %cst_20 = arith.constant 0.000000e+00 : f32
    %41 = vector.broadcast %cst_20 : f32 to vector<2x1xf32>
    %42 = arith.maximumf %40, %41 : vector<2x1xf32>
    %43 = math.sqrt %42 : vector<2x1xf32>
    %c2_i32 = arith.constant 2 : i32
    %44 = arith.muli %arg0, %c2_i32 : i32
    %45 = tpu.iota {dimensions = array<i32: 0>} : vector<2x1xi32>
    %46 = vector.broadcast %44 : i32 to vector<2x1xi32>
    %47 = arith.addi %46, %45 : vector<2x1xi32>
    %c2_i32_21 = arith.constant 2 : i32
    %48 = vector.broadcast %c2_i32_21 : i32 to vector<2x1xi32>
    %49 = arith.cmpi slt, %47, %48 : vector<2x1xi32>
    %cst_22 = arith.constant 0.000000e+00 : f32
    %50 = vector.broadcast %cst_22 : f32 to vector<2x1xf32>
    %51 = arith.select %49, %43, %50 : vector<2x1xi1>, vector<2x1xf32>
    %cst_23 = arith.constant dense<0.000000e+00> : vector<1xf32>
    %52 = vector.multi_reduction <add>, %51, %cst_23 [0] : vector<2x1xf32> to vector<1xf32>
    %53 = vector.shape_cast %52 : vector<1xf32> to vector<1x1xf32>
    %54 = vector.shape_cast %53 : vector<1x1xf32> to vector<1x1x1xf32>
    %55 = vector.shape_cast %54 : vector<1x1x1xf32> to vector<1x1x1xf32>
    %56 = vector.broadcast %55 : vector<1x1x1xf32> to vector<1x8x128xf32>
    %c0_24 = arith.constant 0 : index
    %c0_25 = arith.constant 0 : index
    %c0_26 = arith.constant 0 : index
    %57 = vector.load %arg5[%c0_24, %c0_25, %c0_26] : memref<1x8x128xf32, #tpu.memory_space<vmem>>, vector<1x8x128xf32>
    tpu.vector_store %arg5[%c0_24, %c0_25, %c0_26], %56 {strides = array<i32>} : memref<1x8x128xf32, #tpu.memory_space<vmem>>, vector<1x8x128xf32>,
    return
  }
  func.func @transform_0(%arg0: i32) -> (i32, i32) {
    %c0_i32 = arith.constant 0 : i32
    %c0_i32_0 = arith.constant 0 : i32
    return %arg0, %c0_i32 : i32, i32
  }
  func.func @transform_1(%arg0: i32) -> (i32, i32) {
    %c0_i32 = arith.constant 0 : i32
    %c0_i32_0 = arith.constant 0 : i32
    %c0_i32_1 = arith.constant 0 : i32
    return %c0_i32, %c0_i32_0 : i32, i32
  }
  func.func @transform_2(%arg0: i32) -> (i32, i32) {
    %c0_i32 = arith.constant 0 : i32
    %c0_i32_0 = arith.constant 0 : i32
    %c0_i32_1 = arith.constant 0 : i32
    return %c0_i32, %c0_i32_0 : i32, i32
  }
  func.func @transform_3(%arg0: i32) -> (i32, i32) {
    %c0_i32 = arith.constant 0 : i32
    %c0_i32_0 = arith.constant 0 : i32
    return %arg0, %c0_i32 : i32, i32
  }
  func.func @transform_4(%arg0: i32) -> (i32, i32, i32) {
    %c0_i32 = arith.constant 0 : i32
    %c0_i32_0 = arith.constant 0 : i32
    %c0_i32_1 = arith.constant 0 : i32
    return %arg0, %c0_i32, %c0_i32_0 : i32, i32, i32
  }
}

</mosaic_0001>

<bundles_post_ra>
// kernel: tpu_custom_call.1
= control target key start
LH: loop header
LB: loop body
LE: loop exit
PB: predicated region body
PF: predicated region fallthrough
CT: control target
= control target key end

     0   :  { %9 = vsyncpa [#allocation3], 0  ;;  %s1472_s0 = inlined_call_operand.hbm [shape: bf16[2,1024], index: 0, kind: input, shape index: {}]   ;;  %s1473_s1 = inlined_call_operand.hbm [shape: bf16[1024,128], index: 1, kind: input, shape index: {}]   ;;  %s1474_s2 = inlined_call_operand.hbm [shape: f32[128,128], index: 2, kind: input, shape index: {}]   ;;  %s1475_s3 = inlined_call_operand.vmem [shape: f32[2,128], index: 3, kind: input, shape index: {}]   ;;  %s1476_s4 = inlined_call_operand.hbm [shape: f32[1,8,128], index: 4, kind: output, shape index: {}]  }
   0x1   :  { %10 = vsyncpa [#allocation6], 0 }
   0x2   :  { %11 = vsyncpa [#allocation4], 0  ;;  %s1359_s15 = smov [#allocation5]   ;;  %s1265_s19 = scalar_lea.hbm %s1473_s1, 8192 }
   0x3   :  { %s27_s16 = sshll.u32 %s1359_s15, 4  ;;  %p1266_p0 = scmp.ne.s32.totalorder %s1473_s1, %s1265_s19  ;;  %s28_s16 = int_to_ptr.vmem [resolvable:$true] %s27_s16 }
   0x4   :  { %p1269_p1 = scmp.lt.u32.totalorder %s1265_s19, %s1473_s1 }
   0x6   :  { %p1271_p2 = pnand %p1269_p1, %p1266_p0 }
   0x8   :  { %1274 = shalt.err (!%p1271_p2)
}
   0x9   :  { %s1275_s24 = scalar_lea.vmem %s28_s16, 8192  ;;  %p1280_p4 = scmp.lt.s32.totalorder %s28_s16, %s28_s16 }
   0xa   :  { %p1276_p3 = scmp.ne.s32.totalorder %s28_s16, %s1275_s24  ;;  %p1281_p5 = scmp.lt.s32.totalorder %s1275_s24, %s1275_s24 }
   0xc   :  { %p1282_p6 = por %p1281_p5, %p1280_p4 }
   0xe   :  { %p1283_p7 = pnand %p1282_p6, %p1276_p3 }
  0x10   :  { %1286 = shalt.err (!%p1283_p7)
}
  0x11   :  { %s1360_s25 = smov 64   ;;  %s1361_s26 = smov 4  }
  0x12   :  { %33 = dma.hbm_to_vmem [thread:$0]  %s1473_s1, 8192, %s28_s16, [#allocation6], %s1360_s25, %s1360_s25, %s1361_s26  }
  0x13   :  { %s1362_s29 = smov [#allocation2]   ;;  %s1363_s5 = smov [#allocation7]  }
  0x14   :  { %s18_s30 = sshll.u32 %s1362_s29, 4  ;;  %s39_s6 = sshll.u32 %s1363_s5, 4  ;;  %s19_s30 = int_to_ptr.vmem [resolvable:$true] %s18_s30  ;;  %s40_s6 = int_to_ptr.vmem [resolvable:$true] %s39_s6 }
  0x15   :  { %s1287_s9 = scalar_lea.hbm %s1472_s0, 128 }
  0x16   :  { %p1288_p8 = scmp.ne.s32.totalorder %s1472_s0, %s1287_s9  ;;  %p1291_p9 = scmp.lt.u32.totalorder %s1287_s9, %s1472_s0 }
  0x18   :  { %p1293_p10 = pnand %p1291_p9, %p1288_p8 }
  0x1a   :  { %1296 = shalt.err (!%p1293_p10)
}
  0x1b   :  { %s1297_s1 = scalar_lea.vmem %s19_s30, 128  ;;  %p1302_p12 = scmp.lt.s32.totalorder %s19_s30, %s19_s30 }
  0x1c   :  { %p1298_p11 = scmp.ne.s32.totalorder %s19_s30, %s1297_s1  ;;  %p1303_p13 = scmp.lt.s32.totalorder %s1297_s1, %s1297_s1 }
  0x1e   :  { %p1304_p0 = por %p1303_p13, %p1302_p12 }
  0x20   :  { %p1305_p1 = pnand %p1304_p0, %p1298_p11 }
  0x22   :  { %1308 = shalt.err (!%p1305_p1)
}
  0x23   :  { %21 = dma.hbm_to_vmem [thread:$0]  %s1472_s0, 128, %s19_s30, [#allocation3]  }
  0x24   :  { %s1309_s18 = scalar_lea.hbm %s1474_s2, 2048 }
  0x25   :  { %p1310_p2 = scmp.ne.s32.totalorder %s1474_s2, %s1309_s18  ;;  %p1313_p3 = scmp.lt.u32.totalorder %s1309_s18, %s1474_s2 }
  0x27   :  { %p1315_p4 = pnand %p1313_p3, %p1310_p2 }
  0x29   :  { %1318 = shalt.err (!%p1315_p4)
}
  0x2a   :  { %s1319_s23 = scalar_lea.vmem %s40_s6, 2048  ;;  %p1324_p6 = scmp.lt.s32.totalorder %s40_s6, %s40_s6 }
  0x2b   :  { %p1320_p5 = scmp.ne.s32.totalorder %s40_s6, %s1319_s23  ;;  %p1325_p7 = scmp.lt.s32.totalorder %s1319_s23, %s1319_s23 }
  0x2d   :  { %p1326_p8 = por %p1325_p7, %p1324_p6 }
  0x2f   :  { %p1327_p9 = pnand %p1326_p8, %p1320_p5 }
  0x31   :  { %1330 = shalt.err (!%p1327_p9)
}
  0x32   :  { %s1364_s0 = smov 128   ;;  %s1365_s24 = smov 8  }
  0x33   :  { %45 = dma.hbm_to_vmem [thread:$0]  %s1474_s2, 2048, %s40_s6, [#allocation6], %s1364_s0, %s1364_s0, %s1365_s24  }
  0x34   :  { %1353 = dma.done.wait [#allocation3], 128  }
  0x35   :  { %1354 = vsyncadd [#allocation3], 4294967168 }
  0x36   :  { %1355 = dma.done.wait [#allocation6], 10240  }
  0x37   :  { %1356 = vsyncadd [#allocation6], 4294957056  ;;  %v1192_v0 = vld [vmem:[#allocation5 + $0x40] sm:$0xff]   ;;  %v1196_v4 = vld [vmem:[#allocation5 + $0x48] sm:$0xff]   ;;  %v1366_v22 = vmov 1966171168   ;;  %v193_v24 = vlaneseq }
  0x38   :  { %v1193_v1 = vld [vmem:[#allocation5 + $0xc0] sm:$0xff]   ;;  %1016 = vmatprep.subr.bf16.mxu0 %v1192_v0  ;;  %v1197_v5 = vld [vmem:[#allocation5 + $0xc8] sm:$0xff]   ;;  %v1200_v8 = vld [vmem:[#allocation5 + $0x50] sm:$0xff]   ;;  %v191_v23 = vunpack.c.l.s4 %v1366_v22  ;;  %vm793_vm0 = vcmask 1041408   ;;  %vm1368_vm1 = vmmov 0  }
  0x39   :  { %v1194_v2 = vld [vmem:[#allocation5] sm:$0xff]   ;;  %1038 = vmatprep.subr.bf16.mxu1 %v1193_v1  ;;  %v1198_v6 = vld [vmem:[#allocation5 + $0x8] sm:$0xff]   ;;  %v1201_v9 = vld [vmem:[#allocation5 + $0xd0] sm:$0xff]   ;;  %v1432_v30 = vshrl.u32 %v193_v24, 7 }
  0x3a   :  { %v1195_v3 = vld [vmem:[#allocation5 + $0x80] sm:$0xff]   ;;  %1017 = vmatpush3.bf16.msra.mxu0 %v1194_v2  ;;  %v1199_v7 = vld [vmem:[#allocation5 + $0x88] sm:$0xff]   ;;  %v1202_v10 = vld [vmem:[#allocation5 + $0x10] sm:$0xff]   ;;  %v192_v29 = vunpack.c.0.s8 %v191_v23  ;;  %v1367_v23 = vmov 0.0|0.0  }
  0x3b   :  { %1039 = vmatpush3.bf16.msra.mxu1 %v1195_v3  ;;  %1018 = vmatprep.subr.bf16.mxu0 %v1196_v4  ;;  %v1203_v11 = vld [vmem:[#allocation5 + $0x90] sm:$0xff]   ;;  %v1204_v12 = vld [vmem:[#allocation5 + $0x58] sm:$0xff]   ;;  %v1208_v16 = vld [vmem:[#allocation5 + $0x60] sm:$0xff]   ;;  %vm924_vm5 = vcmp.lt.s32.totalorder %v1432_v30, 2 }
  0x3c   :  { %1040 = vmatprep.subr.bf16.mxu1 %v1197_v5  ;;  %v1205_v13 = vld [vmem:[#allocation5 + $0xd8] sm:$0xff]   ;;  %v1209_v17 = vld [vmem:[#allocation5 + $0xe0] sm:$0xff]   ;;  %v1212_v20 = vld [vmem:[#allocation5 + $0x68] sm:$0xff]   ;;  %v1435_v35 = vsub.s32 %v192_v29, %v1432_v30 }
  0x3d   :  { %v1206_v14 = vld [vmem:[#allocation5 + $0x18] sm:$0xff]   ;;  %v1210_v18 = vld [vmem:[#allocation5 + $0x20] sm:$0xff]   ;;  %v1213_v21 = vld [vmem:[#allocation5 + $0xe8] sm:$0xff]  }
  0x3e   :  { %1019 = vmatpush3.bf16.msra.mxu0 %v1198_v6  ;;  %v1207_v15 = vld [vmem:[#allocation5 + $0x98] sm:$0xff]   ;;  %v1211_v19 = vld [vmem:[#allocation5 + $0xa0] sm:$0xff]   ;;  %v1214_v25 = vld [vmem:[#allocation5 + $0x28] sm:$0xff]  }
  0x3f   :  { %1041 = vmatpush3.bf16.msra.mxu1 %v1199_v7  ;;  %1020 = vmatprep.subr.bf16.mxu0 %v1200_v8  ;;  %v1215_v26 = vld [vmem:[#allocation5 + $0xa8] sm:$0xff]   ;;  %v1216_v27 = vld [vmem:[#allocation5 + $0x70] sm:$0xff]   ;;  %v1220_v33 = vld [vmem:[#allocation5 + $0x78] sm:$0xff]  }
  0x40   :  { %1042 = vmatprep.subr.bf16.mxu1 %v1201_v9  ;;  %v1217_v28 = vld [vmem:[#allocation5 + $0xf0] sm:$0xff]   ;;  %v1221_v34 = vld [vmem:[#allocation5 + $0xf8] sm:$0xff]   ;;  %v1225_v41 = vld [vmem:[#allocation5 + $0x140] sm:$0xff]  }
  0x41   :  { %v1218_v31 = vld [vmem:[#allocation5 + $0x30] sm:$0xff]   ;;  %v1222_v36 = vld [vmem:[#allocation5 + $0x38] sm:$0xff]   ;;  %v1226_v42 = vld [vmem:[#allocation5 + $0x1c0] sm:$0xff]  }
  0x42   :  { %1021 = vmatpush3.bf16.msra.mxu0 %v1202_v10  ;;  %v1219_v32 = vld [vmem:[#allocation5 + $0xb0] sm:$0xff]   ;;  %v1223_v37 = vld [vmem:[#allocation5 + $0xb8] sm:$0xff]   ;;  %v1227_v47 = vld [vmem:[#allocation5 + $0x100] sm:$0xff]  }
  0x43   :  { %1043 = vmatpush3.bf16.msra.mxu1 %v1203_v11  ;;  %1022 = vmatprep.subr.bf16.mxu0 %v1204_v12  ;;  %v59_v38 = vld [vmem:[#allocation2] sm:$0xff]  ;;  %v1229_v50 = vld [vmem:[#allocation5 + $0x148] sm:$0xff]   ;;  %v1228_v52 = vld [vmem:[#allocation5 + $0x180] sm:$0xff]  }
  0x44   :  { %1044 = vmatprep.subr.bf16.mxu1 %v1205_v13  ;;  %v189_v39 = vcombine.high %v59_v38, %v59_v38  ;;  %v196_v40 = vrot.slane %v59_v38, %v1435_v35  ;;  %v1230_v54 = vld [vmem:[#allocation5 + $0x1c8] sm:$0xff]   ;;  %v1233_v57 = vld [vmem:[#allocation5 + $0x150] sm:$0xff]   ;;  %v1237_v61 = vld [vmem:[#allocation5 + $0x158] sm:$0xff]  }
  0x45   :  { %v1231_v55 = vld [vmem:[#allocation5 + $0x108] sm:$0xff]   ;;  %v1234_v59 = vld [vmem:[#allocation5 + $0x1d0] sm:$0xff]   ;;  %v1238_v63 = vld [vmem:[#allocation5 + $0x1d8] sm:$0xff]  }
  0x46   :  { %1023 = vmatpush3.bf16.msra.mxu0 %v1206_v14  ;;  %v204_v43 = vcombine.high %v196_v40, %v196_v40  ;;  %v212_v44 = vrot.slane %v196_v40, %v1435_v35  ;;  %v1440_v45 = vrot.slane %v189_v39, %v1435_v35  ;;  %v1232_v58 = vld [vmem:[#allocation5 + $0x188] sm:$0xff]   ;;  %v1235_v60 = vld [vmem:[#allocation5 + $0x110] sm:$0xff]   ;;  %v1239_v0 = vld [vmem:[#allocation5 + $0x118] sm:$0xff]  }
  0x47   :  { %1045 = vmatpush3.bf16.msra.mxu1 %v1207_v15  ;;  %1024 = vmatprep.subr.bf16.mxu0 %v1208_v16  ;;  %v1236_v62 = vld [vmem:[#allocation5 + $0x190] sm:$0xff]   ;;  %v1241_v1 = vld [vmem:[#allocation5 + $0x160] sm:$0xff]   ;;  %v1240_v2 = vld [vmem:[#allocation5 + $0x198] sm:$0xff]  }
  0x48   :  { %1046 = vmatprep.subr.bf16.mxu1 %v1209_v17  ;;  %v226_v46 = vrot.slane %v204_v43, %v1435_v35  ;;  %v205_v48 = vcombine.high %v1440_v45, %v1440_v45  ;;  %v234_v49 = vcombine.high %v212_v44, %v212_v44  ;;  %v1242_v3 = vld [vmem:[#allocation5 + $0x1e0] sm:$0xff]   ;;  %v1245_v5 = vld [vmem:[#allocation5 + $0x168] sm:$0xff]   ;;  %v1249_v9 = vld [vmem:[#allocation5 + $0x170] sm:$0xff]   ;;  %v219_v17 = vrot.slane %v1440_v45, %v1435_v35 }
  0x49   :  { %v1243_v4 = vld [vmem:[#allocation5 + $0x120] sm:$0xff]   ;;  %v1246_v7 = vld [vmem:[#allocation5 + $0x1e8] sm:$0xff]   ;;  %v1250_v11 = vld [vmem:[#allocation5 + $0x1f0] sm:$0xff]  }
  0x4a   :  { %1025 = vmatpush3.bf16.msra.mxu0 %v1210_v18  ;;  %662 = vmatprep.mubr.bf16.mxu0 %v226_v46  ;;  %v236_v51 = vcombine.high %v226_v46, %v226_v46  ;;  %v233_v53 = vrot.slane %v205_v48, %v1435_v35  ;;  %v1244_v6 = vld [vmem:[#allocation5 + $0x1a0] sm:$0xff]   ;;  %v1247_v8 = vld [vmem:[#allocation5 + $0x128] sm:$0xff]   ;;  %v1251_v12 = vld [vmem:[#allocation5 + $0x130] sm:$0xff]  }
  0x4b   :  { %1047 = vmatpush3.bf16.msra.mxu1 %v1211_v19  ;;  %1026 = vmatprep.subr.bf16.mxu0 %v1212_v20  ;;  %v1248_v10 = vld [vmem:[#allocation5 + $0x1a8] sm:$0xff]   ;;  %v1253_v13 = vld [vmem:[#allocation5 + $0x178] sm:$0xff]   ;;  %v1252_v14 = vld [vmem:[#allocation5 + $0x1b0] sm:$0xff]   ;;  %v235_v19 = vcombine.high %v219_v17, %v219_v17 }
  0x4c   :  { %1048 = vmatprep.subr.bf16.mxu1 %v1213_v21  ;;  %702 = vmatprep.mubr.bf16.mxu1 %v236_v51  ;;  %v237_v56 = vcombine.high %v233_v53, %v233_v53  ;;  %v1254_v15 = vld [vmem:[#allocation5 + $0x1f8] sm:$0xff]   ;;  %v802_v20 = vld [vmem:[#allocation7] sm:$0xff]  ;;  %v803_v21 = vld [vmem:[#allocation7 + $0x8] sm:$0xff] }
  0x4d   :  { %v1255_v16 = vld [vmem:[#allocation5 + $0x138] sm:$0xff]   ;;  %v804_v22 = vld [vmem:[#allocation7 + $0x10] sm:$0xff]  ;;  %v1157_v24 = vpack.c.bf16 %v803_v21, %v802_v20 }
  0x4e   :  { %1027 = vmatpush3.bf16.msra.mxu0 %v1214_v25  ;;  %v1256_v18 = vld [vmem:[#allocation5 + $0x1b8] sm:$0xff]  }
  0x4f   :  { %1049 = vmatpush3.bf16.msra.mxu1 %v1215_v26  ;;  %1028 = vmatprep.subr.bf16.mxu0 %v1216_v27  ;;  %v805_v25 = vld [vmem:[#allocation7 + $0x18] sm:$0xff]  ;;  %v806_v27 = vld [vmem:[#allocation7 + $0x20] sm:$0xff] }
  0x50   :  { %1050 = vmatprep.subr.bf16.mxu1 %v1217_v28  ;;  %v1160_v26 = vpack.c.bf16 %v805_v25, %v804_v22  ;;  %v807_v28 = vld [vmem:[#allocation7 + $0x28] sm:$0xff] }
  0x51   :  { %v1163_v29 = vpack.c.bf16 %v807_v28, %v806_v27 }
  0x52   :  { %1029 = vmatpush3.bf16.msra.mxu0 %v1218_v31 }
  0x53   :  { %1051 = vmatpush3.bf16.msra.mxu1 %v1219_v32  ;;  %1030 = vmatprep.subr.bf16.mxu0 %v1220_v33 }
  0x54   :  { %1052 = vmatprep.subr.bf16.mxu1 %v1221_v34 }
  0x56   :  { %1031 = vmatpush3.bf16.msra.mxu0 %v1222_v36 }
  0x57   :  { %1053 = vmatpush3.bf16.msra.mxu1 %v1223_v37  ;;  %1060 = vmatprep.subr.bf16.mxu0 %v1225_v41 }
  0x58   :  { %1082 = vmatprep.subr.bf16.mxu1 %v1226_v42 }
  0x59   :  { %663 = vmatmul.mubr.bf16.vlgmr.msra.gmra.mrb[0].mxu0 %v212_v44 }
  0x5a   :  { %1061 = vmatpush3.bf16.msra.mxu0 %v1227_v47  ;;  %703 = vmatmul.mubr.bf16.vlgmr.msra.gmra.mrb[0].mxu1 %v234_v49 }
  0x5b   :  { %1062 = vmatprep.subr.bf16.mxu0 %v1229_v50  ;;  %1083 = vmatpush3.bf16.msra.mxu1 %v1228_v52 }
  0x5c   :  { %742 = vmatprep.mubr.bf16.mxu0 %v233_v53  ;;  %1084 = vmatprep.subr.bf16.mxu1 %v1230_v54  ;;  %v1451_v53 = vld [vmem:[%s1475_s3] sm:$0x3]  ;;  %s1370_s3 = smov [#allocation8]  }
  0x5d   :  { %782 = vmatprep.mubr.bf16.mxu1 %v237_v56  ;;  %s940_s28 = sshll.u32 %s1370_s3, 4  ;;  %s941_s28 = int_to_ptr.vmem [resolvable:$true] %s940_s28 }
  0x5e   :  { %1063 = vmatpush3.bf16.msra.mxu0 %v1231_v55  ;;  %s1331_s29 = scalar_lea.vmem %s941_s28, 128  ;;  %p1336_p11 = scmp.lt.s32.totalorder %s941_s28, %s941_s28 }
  0x5f   :  { %1064 = vmatprep.subr.bf16.mxu0 %v1233_v57  ;;  %1085 = vmatpush3.bf16.msra.mxu1 %v1232_v58  ;;  %p1332_p10 = scmp.ne.s32.totalorder %s941_s28, %s1331_s29  ;;  %p1337_p12 = scmp.lt.s32.totalorder %s1331_s29, %s1331_s29 }
  0x60   :  { %1086 = vmatprep.subr.bf16.mxu1 %v1234_v59  ;;  %v808_v59 = vld [vmem:[#allocation7 + $0x30] sm:$0xff] }
  0x61   :  { %p1338_p13 = por %p1337_p12, %p1336_p11 }
  0x62   :  { %1065 = vmatpush3.bf16.msra.mxu0 %v1235_v60  ;;  %v809_v60 = vld [vmem:[#allocation7 + $0x38] sm:$0xff] }
  0x63   :  { %1066 = vmatprep.subr.bf16.mxu0 %v1237_v61  ;;  %1087 = vmatpush3.bf16.msra.mxu1 %v1236_v62  ;;  %v1166_v61 = vpack.c.bf16 %v809_v60, %v808_v59  ;;  %v810_v62 = vld [vmem:[#allocation7 + $0x40] sm:$0xff]  ;;  %p1339_p0 = pnand %p1338_p13, %p1332_p10 }
  0x64   :  { %1088 = vmatprep.subr.bf16.mxu1 %v1238_v63  ;;  %v811_v63 = vld [vmem:[#allocation7 + $0x48] sm:$0xff] }
  0x66   :  { %1067 = vmatpush3.bf16.msra.mxu0 %v1239_v0  ;;  %v1169_v0 = vpack.c.bf16 %v811_v63, %v810_v62 }
  0x67   :  { %1068 = vmatprep.subr.bf16.mxu0 %v1241_v1  ;;  %1089 = vmatpush3.bf16.msra.mxu1 %v1240_v2  ;;  %v812_v1 = vld [vmem:[#allocation7 + $0x50] sm:$0xff]  ;;  %v813_v2 = vld [vmem:[#allocation7 + $0x58] sm:$0xff] }
  0x68   :  { %1090 = vmatprep.subr.bf16.mxu1 %v1242_v3  ;;  %v1172_v3 = vpack.c.bf16 %v813_v2, %v812_v1 }
  0x6a   :  { %1069 = vmatpush3.bf16.msra.mxu0 %v1243_v4  ;;  %v814_v4 = vld [vmem:[#allocation7 + $0x60] sm:$0xff] }
  0x6b   :  { %1070 = vmatprep.subr.bf16.mxu0 %v1245_v5  ;;  %1091 = vmatpush3.bf16.msra.mxu1 %v1244_v6  ;;  %v815_v5 = vld [vmem:[#allocation7 + $0x68] sm:$0xff] }
  0x6c   :  { %1092 = vmatprep.subr.bf16.mxu1 %v1246_v7  ;;  %v1175_v6 = vpack.c.bf16 %v815_v5, %v814_v4  ;;  %v816_v7 = vld [vmem:[#allocation7 + $0x70] sm:$0xff] }
  0x6e   :  { %1071 = vmatpush3.bf16.msra.mxu0 %v1247_v8  ;;  %v817_v8 = vld [vmem:[#allocation7 + $0x78] sm:$0xff] }
  0x6f   :  { %1072 = vmatprep.subr.bf16.mxu0 %v1249_v9  ;;  %1093 = vmatpush3.bf16.msra.mxu1 %v1248_v10  ;;  %v1178_v9 = vpack.c.bf16 %v817_v8, %v816_v7  ;;  %v1369_v10 = vmov 0.0  }
  0x70   :  { %1094 = vmatprep.subr.bf16.mxu1 %v1250_v11 }
  0x72   :  { %1073 = vmatpush3.bf16.msra.mxu0 %v1251_v12 }
  0x73   :  { %1074 = vmatprep.subr.bf16.mxu0 %v1253_v13  ;;  %1095 = vmatpush3.bf16.msra.mxu1 %v1252_v14 }
  0x74   :  { %1096 = vmatprep.subr.bf16.mxu1 %v1254_v15 }
  0x76   :  { %1075 = vmatpush3.bf16.msra.mxu0 %v1255_v16 }
  0x77   :  { %1097 = vmatpush3.bf16.msra.mxu1 %v1256_v18  ;;  %1156 = vmatprep.subr.bf16.mxu0 %v1367_v23 }
  0x79   :  { %743 = vmatmul.mubr.bf16.vlgmr.msra.gmra.mrb[4].mxu0 %v219_v17 }
  0x7a   :  { %783 = vmatmul.mubr.bf16.vlgmr.msra.gmra.mrb[4].mxu1 %v235_v19  ;;  %1158 = vmatpush3.bf16.msra.mxu0 %v1157_v24 }
  0x7b   :  { %1159 = vmatprep.subr.bf16.mxu0 %v1367_v23  ;;  %1153 = vmatprep.mubr.msk.f32.mxu0 %vm1368_vm1, %v1369_v10 }
  0x7e   :  { %1161 = vmatpush3.bf16.msra.mxu0 %v1160_v26 }
  0x7f   :  { %1162 = vmatprep.subr.bf16.mxu0 %v1367_v23 }
  0x82   :  { %1164 = vmatpush3.bf16.msra.mxu0 %v1163_v29 }
  0x83   :  { %1165 = vmatprep.subr.bf16.mxu0 %v1367_v23 }
  0x86   :  { %1167 = vmatpush3.bf16.msra.mxu0 %v1166_v61 }
  0x87   :  { %1168 = vmatprep.subr.bf16.mxu0 %v1367_v23 }
  0x8a   :  { %1170 = vmatpush3.bf16.msra.mxu0 %v1169_v0 }
  0x8b   :  { %1171 = vmatprep.subr.bf16.mxu0 %v1367_v23 }
  0x8e   :  { %1173 = vmatpush3.bf16.msra.mxu0 %v1172_v3 }
  0x8f   :  { %1174 = vmatprep.subr.bf16.mxu0 %v1367_v23 }
  0x92   :  { %1176 = vmatpush3.bf16.msra.mxu0 %v1175_v6 }
  0x93   :  { %1177 = vmatprep.subr.bf16.mxu0 %v1367_v23 }
  0x96   :  { %1179 = vmatpush3.bf16.msra.mxu0 %v1178_v9 }
 0x12c   :  { %v1032_v31 = vpop.f32.mrb[0].mxu0 }
 0x12d   :  { %v1033_v32 = vpop.f32.mrb[1].mxu0  ;;  %v1054_v33 = vpop.f32.mrb[0].mxu1 }
 0x12e   :  { %v1034_v34 = vadd.f32 %v1033_v32, %v1032_v31  ;;  %v1035_v35 = vpop.f32.mrb[2].mxu0  ;;  %v1055_v36 = vpop.f32.mrb[1].mxu1 }
 0x12f   :  { %v1036_v37 = vpop.f32.mrb[3].mxu0  ;;  %v1056_v38 = vadd.f32 %v1055_v36, %v1054_v33  ;;  %v1057_v39 = vpop.f32.mrb[2].mxu1 }
 0x130   :  { %v1058_v40 = vpop.f32.mrb[3].mxu1 }
 0x131   :  { %v705_v41 = vadd.f32 %v1056_v38, %v1034_v34 }
 0x14c   :  { %v1076_v42 = vpop.f32.mrb[4].mxu0 }
 0x14d   :  { %v1077_v43 = vpop.f32.mrb[5].mxu0  ;;  %v1098_v44 = vpop.f32.mrb[4].mxu1 }
 0x14e   :  { %v1078_v45 = vadd.f32 %v1077_v43, %v1076_v42  ;;  %v1079_v46 = vpop.f32.mrb[6].mxu0  ;;  %v1099_v47 = vpop.f32.mrb[5].mxu1 }
 0x14f   :  { %v1080_v48 = vpop.f32.mrb[7].mxu0  ;;  %v1100_v50 = vadd.f32 %v1099_v47, %v1098_v44  ;;  %v1101_v51 = vpop.f32.mrb[6].mxu1 }
 0x150   :  { %v745_v49 = vadd.f32 %v1078_v45, %v705_v41  ;;  %v1102_v52 = vpop.f32.mrb[7].mxu1 }
 0x152   :  { %v785_v54 = vadd.f32 %v1100_v50, %v745_v49 }
 0x154   :  { %v790_v55 = vsub.f32 %v1451_v53, %v785_v54 }
 0x156   :  { %v791_v56 = vadd.f32 1e-06, %v790_v55 }
 0x158   :  { %v792_v57 = vmul.f32 %v791_v56, %v791_v56 }
 0x15a   :  { %v794_v58 = vsel %vm793_vm0, %v792_v57, 0.0 }
 0x15b   :  { %795 = vadd.xlane.f32.xlu0 %v794_v58 }
 0x1e8   :  { %v796_v11 = vpop.xlane.xlu0 %795 }
 0x1e9   :  { %v1014_v12 = vadd.f32 -1.12e-10, %v796_v11 }
 0x1eb   :  { %v798_v13 = vmax.f32 %v1014_v12, 1e-24 }
 0x1ed   :  { %1257 = vrsqrt.f32 %v798_v13 }
 0x1f7   :  { %v1258_v14 = vpop.eup %1257 }
 0x1f8   :  { %v800_v15 = vsub.f32 0.0, %v1258_v14 }
 0x1fa   :  { %v801_v16 = vmul.f32 %v800_v15, %v791_v56 }
 0x1fc   :  { %1154 = vmatmul.mubr.f32.vlgmr.msra.gmra.mrb[8].mxu0 %v801_v16 }
 0x2cf   :  { %v884_v17 = vpop.f32.mrb[8].mxu0 }
 0x2d0   :  { %v888_v18 = vmul.f32 %v884_v17, %v801_v16  ;;  %v1155_v19 = vpop.f32.mrb[9].mxu0 }
 0x2d2   :  { %v889_v20 = vsel %vm793_vm0, %v888_v18, 0.0 }
 0x2d3   :  { %890 = vadd.xlane.f32.xlu0 %v889_v20 }
 0x360   :  { %v891_v21 = vpop.xlane.xlu0 %890 }
 0x361   :  { %v892_v22 = vmax.f32 %v891_v21, 0.0 }
 0x363   :  { %1259 = vrsqrt.f32 %v892_v22  ;;  %vm895_vm2 = vcmp.eq.f32.partialorder %v892_v22, inf  ;;  %v898_v25 = vand.u32 2147483648, %v892_v22  ;;  %vm897_vm3 = vcmp.eq.f32.partialorder %v892_v22, 0.0 }
 0x36d   :  { %v1260_v23 = vpop.eup %1259 }
 0x36e   :  { %v894_v24 = vmul.f32 %v1260_v23, %v892_v22 }
 0x370   :  { %v896_v26 = vsel %vm895_vm2, %v892_v22, %v894_v24 }
 0x371   :  { %v899_v27 = vsel %vm897_vm3, %v898_v25, %v896_v26 }
 0x372   :  { %v900_v28 = vadd.f32 1e-08, %v899_v27 }
 0x374   :  { %1261 = vrcp.f32 %v900_v28 }
 0x37e   :  { %v1262_v29 = vpop.eup %1261 }
 0x37f   :  { %v902_v31 = vmul.f32 0.5, %v1262_v29 }
 0x381   :  { %v903_v32 = vmul.f32 %v902_v31, %v884_v17 }
 0x383   :  { %v904_v33 = vsub.f32 %v1451_v53, %v903_v32 }
 0x385   :  { %v905_v34 = vadd.f32 1e-06, %v904_v33 }
 0x387   :  { %v906_v35 = vmul.f32 %v905_v34, %v905_v34 }
 0x389   :  { %v907_v36 = vsel %vm793_vm0, %v906_v35, 0.0 }
 0x38a   :  { %908 = vadd.xlane.f32.xlu1 %v907_v36 }
 0x417   :  { %v909_v37 = vpop.xlane.xlu1 %908 }
 0x418   :  { %v1015_v38 = vadd.f32 -1.12e-10, %v909_v37 }
 0x41a   :  { %v911_v39 = vmax.f32 %v1015_v38, 0.0 }
 0x41c   :  { %1263 = vrsqrt.f32 %v911_v39  ;;  %vm914_vm4 = vcmp.eq.f32.partialorder %v911_v39, inf  ;;  %v917_v42 = vand.u32 2147483648, %v911_v39  ;;  %vm916_vm6 = vcmp.eq.f32.partialorder %v911_v39, 0.0 }
 0x426   :  { %v1264_v40 = vpop.eup %1263 }
 0x427   :  { %v913_v41 = vmul.f32 %v1264_v40, %v911_v39 }
 0x429   :  { %v915_v43 = vsel %vm914_vm4, %v911_v39, %v913_v41 }
 0x42a   :  { %v918_v44 = vsel %vm916_vm6, %v917_v42, %v915_v43 }
 0x42b   :  { %v925_v45 = vsel %vm924_vm5, %v918_v44, 0.0 }
 0x42c   :  { %v926_v46 = vsel %vm793_vm0, %v925_v45, 0.0 }
 0x42d   :  { %v927_v47 = vrot.slane %v926_v46, 4 }
 0x42f   :  { %v928_v48 = vadd.f32 %v927_v47, %v926_v46 }
 0x431   :  { %v929_v49 = vrot.slane %v928_v48, 2 }
 0x433   :  { %v930_v50 = vadd.f32 %v929_v49, %v928_v48 }
 0x435   :  { %v931_v51 = vrot.slane %v930_v50, 1 }
 0x437   :  { %v932_v52 = vadd.f32 %v931_v51, %v930_v50 }
 0x439   :  { %933 = vst [vmem:[#allocation8] sm:$0xff] %v932_v52 }
 0x43a   :  { %1342 = shalt.err (!%p1339_p0)
}
 0x43b   :  { %s1343_s6 = scalar_lea.hbm %s1476_s4, 128 }
 0x43c   :  { %p1344_p1 = scmp.ne.s32.totalorder %s1476_s4, %s1343_s6  ;;  %p1347_p2 = scmp.lt.u32.totalorder %s1343_s6, %s1476_s4 }
 0x43e   :  { %p1349_p3 = pnand %p1347_p2, %p1344_p1 }
 0x440   :  { %1352 = shalt.err (!%p1349_p3)
}
 0x441   :  { %943 = dma.vmem_to_hbm [thread:$0]  %s941_s28, 128, %s1476_s4, [#allocation4]  }
 0x442   :  { %1357 = dma.done.wait [#allocation4], 128  }
 0x443   :  { %1358 = vsyncadd [#allocation4], 4294967168 }
 0x444   :  { %947 = vsyncpa [#allocation3], 1 }
 0x445   :  { %948 = vsyncpa [#allocation6], 1 }
 0x446   :  { %949 = vsyncpa [#allocation4], 1 }

</bundles_post_ra>
